<compile_context>
chip_gen: v7x
topology: tpu7x:2x2x1
jax: 0.10.0
libtpu: 0.0.40
codegen_flags: <defaults>
</compile_context>

<pallas_src>
import itertools
from collections.abc import Iterable
from typing import Any

import jax
import jax.numpy as jnp
from jax.experimental import pallas as pl
from jax.experimental.pallas import tpu as pltpu


# ----------------------------------------------------------------------------
# helpers
# ----------------------------------------------------------------------------

def _round_up(n: int, m: int) -> int:
    return ((n + m - 1) // m) * m


def _pad2d(a, rows, cols, dtype):
    """Zero-pad a 2-D array up to (rows, cols) and cast to dtype."""
    out = jnp.zeros((rows, cols), dtype)
    return out.at[: a.shape[0], : a.shape[1]].set(a.astype(dtype))


# ----------------------------------------------------------------------------
# Fused Linear -> Tanh -> Linear Pallas kernel
#   y = tanh(gain * ((x @ W1^T + b1) * scale)) @ W2^T + b2
# ----------------------------------------------------------------------------

def _fused_mlp_kernel(x_ref, w1t_ref, b1_ref, w2t_ref, b2_ref, scalars_ref, o_ref):
    scale = scalars_ref[0]
    gain = scalars_ref[1]
    # First matmul on the MXU: bf16 operands, f32 accumulation.
    h = jnp.dot(x_ref[...], w1t_ref[...], preferred_element_type=jnp.float32)
    # f32 epilogue (VPU bias/scale + EUP tanh hide under MXU slots).
    h = jnp.tanh((h + b1_ref[...]) * (scale * gain))
    # Second matmul; hidden activation stays on-chip (never written to HBM).
    y = jnp.dot(h.astype(jnp.bfloat16), w2t_ref[...],
                preferred_element_type=jnp.float32)
    o_ref[...] = (y + b2_ref[...]).astype(o_ref.dtype)


def fused_mlp(x, w1t_p, b1_p, w2t_p, b2_p, scale, gain, dout):
    """x: (B, Din) f32.  w1t_p: (Din_p, Dh_p) bf16 (pre-transposed, 128-padded).
    b1_p: (1, Dh_p) f32.  w2t_p: (Dh_p, Dout_p) bf16.  b2_p: (1, Dout_p) f32.
    Returns (B, dout) f32."""
    B, _ = x.shape
    Din_p, Dh_p = w1t_p.shape
    Dout_p = w2t_p.shape[1]

    # Batch tiling: bf16 packs 16 rows per sublane pair; tile at 128 rows when
    # the batch is large enough, otherwise use the (padded) full batch.
    TM = 128
    B_pad = _round_up(B, 16)
    if B_pad > TM:
        B_pad = _round_up(B_pad, TM)
        tm = TM
    else:
        tm = B_pad

    x_p = _pad2d(x, B_pad, Din_p, jnp.bfloat16)
    scalars = jnp.stack([jnp.asarray(scale, jnp.float32).reshape(()),
                         jnp.asarray(gain, jnp.float32).reshape(())])

    flops = 2 * B_pad * Din_p * Dh_p + 2 * B_pad * Dh_p * Dout_p
    bytes_accessed = (x_p.size * 2 + w1t_p.size * 2 + w2t_p.size * 2
                      + b1_p.size * 4 + b2_p.size * 4 + B_pad * Dout_p * 4 + 8)

    out_p = pl.pallas_call(
        _fused_mlp_kernel,
        out_shape=jax.ShapeDtypeStruct((B_pad, Dout_p), jnp.float32),
        grid=(B_pad // tm,),
        in_specs=[
            pl.BlockSpec((tm, Din_p), lambda i: (i, 0)),      # x batch tile
            pl.BlockSpec((Din_p, Dh_p), lambda i: (0, 0)),    # W1^T (resident)
            pl.BlockSpec((1, Dh_p), lambda i: (0, 0)),        # b1
            pl.BlockSpec((Dh_p, Dout_p), lambda i: (0, 0)),   # W2^T (resident)
            pl.BlockSpec((1, Dout_p), lambda i: (0, 0)),      # b2
            pl.BlockSpec(memory_space=pltpu.MemorySpace.SMEM),  # [scale, gain]
        ],
        out_specs=pl.BlockSpec((tm, Dout_p), lambda i: (i, 0)),
        compiler_params=pltpu.CompilerParams(
            dimension_semantics=("parallel",),            # shard over v7x's 2 TCs
            vmem_limit_bytes=32 * 1024 * 1024,            # safe on v5e/v6e/v7x
        ),
        cost_estimate=pl.CostEstimate(
            flops=flops,
            transcendentals=B_pad * Dh_p,
            bytes_accessed=bytes_accessed),
    )(x_p, w1t_p, b1_p, w2t_p, b2_p, scalars)

    return out_p[:B, :dout]


# ----------------------------------------------------------------------------
# Small elementwise Pallas kernel (second stage of the demo pipeline):
#   y = alpha * x + beta
# ----------------------------------------------------------------------------

def _scale_shift_kernel(x_ref, s_ref, o_ref):
    o_ref[...] = x_ref[...] * s_ref[0] + s_ref[1]


def pallas_scale_shift(x, alpha, beta):
    s = jnp.stack([jnp.asarray(alpha, jnp.float32).reshape(()),
                   jnp.asarray(beta, jnp.float32).reshape(())])
    return pl.pallas_call(
        _scale_shift_kernel,
        out_shape=jax.ShapeDtypeStruct(x.shape, jnp.float32),
        in_specs=[pl.BlockSpec(memory_space=pltpu.MemorySpace.VMEM),
                  pl.BlockSpec(memory_space=pltpu.MemorySpace.SMEM)],
        out_specs=pl.BlockSpec(memory_space=pltpu.MemorySpace.VMEM),
    )(x, s)


# ----------------------------------------------------------------------------
# "Modules" whose forward runs the Pallas kernels
# ----------------------------------------------------------------------------

class FusedLinearTanhLinear:
    """Fused y = tanh(gain * ((x @ W1^T + b1) * scale)) @ W2^T + b2."""

    def __init__(self, w1, b1, w2, b2):
        dh, din = w1.shape
        dout = w2.shape[0]
        self.din, self.dh, self.dout = din, dh, dout
        din_p, dh_p, dout_p = (_round_up(d, 128) for d in (din, dh, dout))
        # Pre-transpose + zero-pad to lane-dense multiples of 128 once; cast
        # weights to bf16 for the MXU.  Biases stay f32 for the f32 epilogue.
        self.w1t = _pad2d(w1.T, din_p, dh_p, jnp.bfloat16)
        self.b1 = _pad2d(b1.reshape(1, -1), 1, dh_p, jnp.float32)
        self.w2t = _pad2d(w2.T, dh_p, dout_p, jnp.bfloat16)
        self.b2 = _pad2d(b2.reshape(1, -1), 1, dout_p, jnp.float32)

    def __call__(self, x, scale=1.0, gain=1.0):
        return fused_mlp(x, self.w1t, self.b1, self.w2t, self.b2,
                         scale, gain, self.dout)


class ScaleShiftModule:
    def __call__(self, x, alpha=1.0, beta=0.0):
        return pallas_scale_shift(x, alpha, beta)


# ----------------------------------------------------------------------------
# Composable / Composed framework — same semantics as the PyTorch version
# (pure Python argument routing; no tensor compute here)
# ----------------------------------------------------------------------------

class BasicComposable:
    def __init__(self, main: bool, tags: Iterable[str] | None) -> None:
        self._composable_is_main = main
        self._composable_tags = dict.fromkeys(tags) if tags is not None else {}

    def __or__(self, other) -> "Composed":
        if not isinstance(other, BasicComposable):
            other = Composable(other)
        return Composed(self, other)


def get_composed_args(module: BasicComposable,
                      args: list[Any],
                      kwargs: dict[str, Any],
                      tag_kwargs: dict[str, dict[str, Any]] | None
                      ) -> tuple[list[Any], dict[str, Any]]:
    new_args = []
    new_kwargs = {}
    if module._composable_is_main:
        new_args.extend(args)
        new_kwargs.update(kwargs)
    if tag_kwargs:
        if isinstance(module, Composed):
            new_kwargs['tag_kwargs'] = tag_kwargs
        else:
            for tag in module._composable_tags:
                these_tag_kwargs = tag_kwargs.get(tag)
                if these_tag_kwargs is not None:
                    new_kwargs.update(these_tag_kwargs)
    return (new_args, new_kwargs)


class Composed(BasicComposable):
    """A composition of two modules."""

    def __init__(self, first: BasicComposable, second: BasicComposable) -> None:
        super().__init__(
            first._composable_is_main or second._composable_is_main,
            itertools.chain(first._composable_tags.keys(),
                            second._composable_tags.keys()))
        self.first = first
        self.second = second

    def __call__(self, x, *args, tag_kwargs=None, **kwargs):
        first_args, first_kwargs = get_composed_args(self.first, args, kwargs, tag_kwargs)
        second_args, second_kwargs = get_composed_args(self.second, args, kwargs, tag_kwargs)
        return self.second(self.first(x, *first_args, **first_kwargs),
                           *second_args, **second_kwargs)


class Composable(BasicComposable):
    """Wraps any callable module so it can be used in a `|` pipeline."""

    def __init__(self, module, main: bool = False,
                 tags: Iterable[str] | None = None,
                 kwargs: dict[str, Any] | None = None) -> None:
        super().__init__(main, tags)
        self.module = module
        self._composable_kwargs = kwargs if kwargs is not None else {}

    def __call__(self, *args, **kwargs):
        return self.module(*args, **self._composable_kwargs, **kwargs)

    def main(self) -> "Composable":
        self._composable_is_main = True
        return self

    def tag(self, tag: str) -> "Composable":
        self._composable_tags[tag] = None
        return self

    def kwargs(self, **kwargs) -> "Composable":
        self._composable_kwargs.update(kwargs)
        return self


# ----------------------------------------------------------------------------
# Demo: fused main module (scale=/gain= via main kwargs) | tagged elementwise
#       module (alpha via tag_kwargs, beta via bound kwargs)
# ----------------------------------------------------------------------------

if __name__ == "__main__":
    key = jax.random.PRNGKey(0)
    k1, k2, k3, k4, kx = jax.random.split(key, 5)

    B, Din, Dh, Dout = 8, 32, 64, 32
    w1 = jax.random.normal(k1, (Dh, Din), jnp.float32) * 0.1   # PyTorch (out, in)
    b1 = jax.random.normal(k2, (Dh,), jnp.float32) * 0.1
    w2 = jax.random.normal(k3, (Dout, Dh), jnp.float32) * 0.1
    b2 = jax.random.normal(k4, (Dout,), jnp.float32) * 0.1
    x = jax.random.normal(kx, (B, Din), jnp.float32)

    beta = 0.25
    pipeline = (
        Composable(FusedLinearTanhLinear(w1, b1, w2, b2)).main()   # scale=, gain= from top-level kwargs
        | Composable(ScaleShiftModule()).tag("post").kwargs(beta=beta)  # alpha via tag_kwargs, beta bound
    )

    @jax.jit
    def run_pipeline(x, scale, gain, alpha):
        return pipeline(x, scale=scale, gain=gain,
                        tag_kwargs={"post": {"alpha": alpha}})

    scale, gain, alpha = 0.5, 1.5, 2.0
    out = run_pipeline(x, jnp.float32(scale), jnp.float32(gain), jnp.float32(alpha))
    out = jax.block_until_ready(out)

    # (a) Pure f32 reference of the composed forward pass.
    hidden_f32 = jnp.tanh(gain * ((x @ w1.T + b1) * scale))
    ref_f32 = alpha * (hidden_f32 @ w2.T + b2) + beta
    # (b) Precision-matched reference (bf16 operands, f32 accumulation).
    bf = jnp.bfloat16
    h = jnp.dot(x.astype(bf), w1.T.astype(bf), preferred_element_type=jnp.float32)
    h = jnp.tanh((h + b1) * (scale * gain))
    y = jnp.dot(h.astype(bf), w2.T.astype(bf), preferred_element_type=jnp.float32) + b2
    ref_bf16 = alpha * y + beta

    assert out.shape == (B, Dout)
    assert jnp.allclose(out, ref_bf16, atol=2e-3, rtol=2e-3), \
        float(jnp.max(jnp.abs(out - ref_bf16)))
    assert jnp.allclose(out, ref_f32, atol=5e-2, rtol=5e-2), \
        float(jnp.max(jnp.abs(out - ref_f32)))

    print("KERNEL_OK")
</pallas_src>

<mosaic_0001>
module attributes {stable_mosaic.version = 11 : i64} {
  func.func @_fused_mlp_kernel(%arg0: i32, %arg1: memref<16x128xbf16, #tpu.memory_space<vmem>>, %arg2: memref<128x128xbf16, #tpu.memory_space<vmem>>, %arg3: memref<1x128xf32, #tpu.memory_space<vmem>>, %arg4: memref<128x128xbf16, #tpu.memory_space<vmem>>, %arg5: memref<1x128xf32, #tpu.memory_space<vmem>>, %arg6: memref<2xf32, #tpu.memory_space<smem>>, %arg7: memref<16x128xf32, #tpu.memory_space<vmem>>) attributes {dimension_semantics = [#tpu.dimension_semantics<parallel>], iteration_bounds = array<i64: 1>, scalar_prefetch = 0 : i64, scratch_operands = 0 : i64, tpu.core_type = #tpu.core_type<tc>, window_params = [{transform_indices = @transform_0, window_bounds = array<i64: 16, 128>}, {pipeline_mode = #tpu.pipeline_mode<synchronous>, transform_indices = @transform_1, window_bounds = array<i64: 128, 128>}, {pipeline_mode = #tpu.pipeline_mode<synchronous>, transform_indices = @transform_2, window_bounds = array<i64: 1, 128>}, {pipeline_mode = #tpu.pipeline_mode<synchronous>, transform_indices = @transform_3, window_bounds = array<i64: 128, 128>}, {pipeline_mode = #tpu.pipeline_mode<synchronous>, transform_indices = @transform_4, window_bounds = array<i64: 1, 128>}, {transform_indices = @transform_5, window_bounds = array<i64: 2>}, {transform_indices = @transform_6, window_bounds = array<i64: 16, 128>}]} {
    %c0 = arith.constant 0 : index
    %0 = memref.load %arg6[%c0] : memref<2xf32, #tpu.memory_space<smem>>
    %c1 = arith.constant 1 : index
    %1 = memref.load %arg6[%c1] : memref<2xf32, #tpu.memory_space<smem>>
    %c0_0 = arith.constant 0 : index
    %c0_1 = arith.constant 0 : index
    %2 = vector.load %arg1[%c0_0, %c0_1] : memref<16x128xbf16, #tpu.memory_space<vmem>>, vector<16x128xbf16>
    %c0_2 = arith.constant 0 : index
    %c0_3 = arith.constant 0 : index
    %3 = vector.load %arg2[%c0_2, %c0_3] : memref<128x128xbf16, #tpu.memory_space<vmem>>, vector<128x128xbf16>
    %cst = arith.constant dense<0.000000e+00> : vector<16x128xf32>
    %4 = tpu.matmul %2, %3, %cst {dimension_numbers = #tpu.dot_dimension_numbers<[1], [0], [0], [1], [0, 0, 1, 1], [], []>} : vector<16x128xbf16>, vector<128x128xbf16>, vector<16x128xf32> -> vector<16x128xf32>
    %c0_4 = arith.constant 0 : index
    %c0_5 = arith.constant 0 : index
    %5 = vector.load %arg3[%c0_4, %c0_5] : memref<1x128xf32, #tpu.memory_space<vmem>>, vector<1x128xf32>
    %6 = vector.broadcast %5 : vector<1x128xf32> to vector<16x128xf32>
    %7 = arith.addf %4, %6 : vector<16x128xf32>
    %8 = arith.mulf %0, %1 : f32
    %9 = vector.broadcast %8 : f32 to vector<16x128xf32>
    %10 = arith.mulf %7, %9 : vector<16x128xf32>
    %11 = math.tanh %10 : vector<16x128xf32>
    %12 = arith.truncf %11 : vector<16x128xf32> to vector<16x128xbf16>
    %c0_6 = arith.constant 0 : index
    %c0_7 = arith.constant 0 : index
    %13 = vector.load %arg4[%c0_6, %c0_7] : memref<128x128xbf16, #tpu.memory_space<vmem>>, vector<128x128xbf16>
    %cst_8 = arith.constant dense<0.000000e+00> : vector<16x128xf32>
    %14 = tpu.matmul %12, %13, %cst_8 {dimension_numbers = #tpu.dot_dimension_numbers<[1], [0], [0], [1], [0, 0, 1, 1], [], []>} : vector<16x128xbf16>, vector<128x128xbf16>, vector<16x128xf32> -> vector<16x128xf32>
    %c0_9 = arith.constant 0 : index
    %c0_10 = arith.constant 0 : index
    %15 = vector.load %arg5[%c0_9, %c0_10] : memref<1x128xf32, #tpu.memory_space<vmem>>, vector<1x128xf32>
    %16 = vector.broadcast %15 : vector<1x128xf32> to vector<16x128xf32>
    %17 = arith.addf %14, %16 : vector<16x128xf32>
    %c0_11 = arith.constant 0 : index
    %c0_12 = arith.constant 0 : index
    %18 = vector.load %arg7[%c0_11, %c0_12] : memref<16x128xf32, #tpu.memory_space<vmem>>, vector<16x128xf32>
    tpu.vector_store %arg7[%c0_11, %c0_12], %17 {strides = array<i32>} : memref<16x128xf32, #tpu.memory_space<vmem>>, vector<16x128xf32>,
    return
  }
  func.func @transform_0(%arg0: i32) -> (i32, i32) {
    %c0_i32 = arith.constant 0 : i32
    %c0_i32_0 = arith.constant 0 : i32
    return %arg0, %c0_i32 : i32, i32
  }
  func.func @transform_1(%arg0: i32) -> (i32, i32) {
    %c0_i32 = arith.constant 0 : i32
    %c0_i32_0 = arith.constant 0 : i32
    %c0_i32_1 = arith.constant 0 : i32
    return %c0_i32, %c0_i32_0 : i32, i32
  }
  func.func @transform_2(%arg0: i32) -> (i32, i32) {
    %c0_i32 = arith.constant 0 : i32
    %c0_i32_0 = arith.constant 0 : i32
    %c0_i32_1 = arith.constant 0 : i32
    return %c0_i32, %c0_i32_0 : i32, i32
  }
  func.func @transform_3(%arg0: i32) -> (i32, i32) {
    %c0_i32 = arith.constant 0 : i32
    %c0_i32_0 = arith.constant 0 : i32
    %c0_i32_1 = arith.constant 0 : i32
    return %c0_i32, %c0_i32_0 : i32, i32
  }
  func.func @transform_4(%arg0: i32) -> (i32, i32) {
    %c0_i32 = arith.constant 0 : i32
    %c0_i32_0 = arith.constant 0 : i32
    %c0_i32_1 = arith.constant 0 : i32
    return %c0_i32, %c0_i32_0 : i32, i32
  }
  func.func @transform_5(%arg0: i32) -> i32 {
    %c0_i32 = arith.constant 0 : i32
    %c0_i32_0 = arith.constant 0 : i32
    return %c0_i32 : i32
  }
  func.func @transform_6(%arg0: i32) -> (i32, i32) {
    %c0_i32 = arith.constant 0 : i32
    %c0_i32_0 = arith.constant 0 : i32
    return %arg0, %c0_i32 : i32, i32
  }
}

module attributes {stable_mosaic.version = 11 : i64} {
  func.func @_scale_shift_kernel(%arg0: memref<8x32xf32, #tpu.memory_space<vmem>>, %arg1: memref<2xf32, #tpu.memory_space<smem>>, %arg2: memref<8x32xf32, #tpu.memory_space<vmem>>) attributes {dimension_semantics = [], scalar_prefetch = 0 : i64, scratch_operands = 0 : i64, tpu.core_type = #tpu.core_type<tc>} {
    %c0 = arith.constant 0 : index
    %c0_0 = arith.constant 0 : index
    %0 = vector.load %arg0[%c0, %c0_0] : memref<8x32xf32, #tpu.memory_space<vmem>>, vector<8x32xf32>
    %c0_1 = arith.constant 0 : index
    %1 = memref.load %arg1[%c0_1] : memref<2xf32, #tpu.memory_space<smem>>
    %2 = vector.broadcast %1 : f32 to vector<8x32xf32>
    %3 = arith.mulf %0, %2 : vector<8x32xf32>
    %c1 = arith.constant 1 : index
    %4 = memref.load %arg1[%c1] : memref<2xf32, #tpu.memory_space<smem>>
    %5 = vector.broadcast %4 : f32 to vector<8x32xf32>
    %6 = arith.addf %3, %5 : vector<8x32xf32>
    %c0_2 = arith.constant 0 : index
    %c0_3 = arith.constant 0 : index
    %7 = vector.load %arg2[%c0_2, %c0_3] : memref<8x32xf32, #tpu.memory_space<vmem>>, vector<8x32xf32>
    tpu.vector_store %arg2[%c0_2, %c0_3], %6 {strides = array<i32>} : memref<8x32xf32, #tpu.memory_space<vmem>>, vector<8x32xf32>,
    return
  }
}

</mosaic_0001>

<bundles_post_ra>
// kernel: run_pipeline.3
= control target key start
LH: loop header
LB: loop body
LE: loop exit
PB: predicated region body
PF: predicated region fallthrough
CT: control target
= control target key end

     0   :  { %7 = vsyncpa [#allocation4], 0  ;;  %s125_s0 = inlined_call_operand.vmem [shape: f32[8,32], index: 0, kind: input, shape index: {}]   ;;  %s126_s1 = inlined_call_operand.vmem [shape: f32[2], index: 1, kind: input, shape index: {}]   ;;  %s127_s2 = inlined_call_operand.hbm [shape: f32[8,32], index: 2, kind: output, shape index: {}]  }
   0x1   :  { %8 = vsyncpa [#allocation3], 0  ;;  %s17_s11 = sshll.u32 %s126_s1, 4  ;;  %s18_s11 = int_to_ptr.vmem [resolvable:$true] %s17_s11 }
   0x2   :  { %s52_s12 = scalar_lea.vmem %s18_s11, 16  ;;  %p57_p1 = scmp.lt.s32.totalorder %s18_s11, %s18_s11 }
   0x3   :  { %p53_p0 = scmp.ne.s32.totalorder %s18_s11, %s52_s12  ;;  %p58_p2 = scmp.lt.s32.totalorder %s52_s12, %s52_s12 }
   0x5   :  { %p59_p3 = por %p58_p2, %p57_p1 }
   0x7   :  { %p60_p4 = pnand %p59_p3, %p53_p0 }
   0x9   :  { %63 = shalt.err (!%p60_p4)
}
   0xa   :  { %s90_s13 = smov [#allocation2]  }
   0xb   :  { %20 = dma.vmem_to_smem %s18_s11, 16, %s90_s13, [#allocation4]  }
   0xc   :  { %86 = dma.done.wait [#allocation4], 16  }
   0xd   :  { %87 = vsyncadd [#allocation4], 4294967280 }
   0xe   :  { %24 = sfence }
   0xf   :  { %s26_s14 = sld [smem:[#allocation2]]  ;;  %s49_s15 = sld [smem:[#allocation2 + $0x1]]  ;;  %v25_v0 = vld [vmem:[%s125_s0] sm:$0xff]  ;;  %vm32_vm0 = vcmask 261120  }
  0x10   :  { %s91_s1 = smov [#allocation5]  }
  0x11   :  { %s40_s18 = sshll.u32 %s91_s1, 4  ;;  %s41_s18 = int_to_ptr.vmem [resolvable:$true] %s40_s18 }
  0x12   :  { %s64_s19 = scalar_lea.vmem %s41_s18, 128  ;;  %p69_p6 = scmp.lt.s32.totalorder %s41_s18, %s41_s18 }
  0x13   :  { %p65_p5 = scmp.ne.s32.totalorder %s41_s18, %s64_s19  ;;  %p70_p7 = scmp.lt.s32.totalorder %s64_s19, %s64_s19 }
  0x15   :  { %v27_v1 = vstv %s26_s14  ;;  %v30_v2 = vstv %s49_s15  ;;  %p71_p8 = por %p70_p7, %p69_p6 }
  0x16   :  { %v28_v3 = vmul.f32 %v27_v1, %v25_v0 }
  0x17   :  { %p72_p9 = pnand %p71_p8, %p65_p5 }
  0x18   :  { %v31_v4 = vadd.f32 %v30_v2, %v28_v3 }
  0x1a   :  { %33 = vst.msk [vmem:[#allocation5] sm:$0xff] %vm32_vm0, %v31_v4 }
  0x1b   :  { %75 = shalt.err (!%p72_p9)
}
  0x1c   :  { %s76_s0 = scalar_lea.hbm %s127_s2, 128 }
  0x1d   :  { %p77_p10 = scmp.ne.s32.totalorder %s127_s2, %s76_s0  ;;  %p80_p11 = scmp.lt.u32.totalorder %s76_s0, %s127_s2 }
  0x1f   :  { %p82_p12 = pnand %p80_p11, %p77_p10 }
  0x21   :  { %85 = shalt.err (!%p82_p12)
}
  0x22   :  { %43 = dma.vmem_to_hbm [thread:$0]  %s41_s18, 128, %s127_s2, [#allocation3]  }
  0x23   :  { %88 = dma.done.wait [#allocation3], 128  }
  0x24   :  { %89 = vsyncadd [#allocation3], 4294967168 }
  0x25   :  { %47 = vsyncpa [#allocation3], 1 }
  0x26   :  { %48 = vsyncpa [#allocation4], 1 }

// kernel: run_pipeline.2
= control target key start
LH: loop header
LB: loop body
LE: loop exit
PB: predicated region body
PF: predicated region fallthrough
CT: control target
= control target key end

     0   :  { %11 = vsyncpa [#allocation3], 0  ;;  %s538_s0 = inlined_call_operand.vmem [shape: bf16[16,128], index: 0, kind: input, shape index: {}]   ;;  %s539_s1 = inlined_call_operand.vmem [shape: bf16[128,128], index: 1, kind: input, shape index: {}]   ;;  %s540_s2 = inlined_call_operand.vmem [shape: f32[1,128], index: 2, kind: input, shape index: {}]   ;;  %s541_s3 = inlined_call_operand.hbm [shape: bf16[128,128], index: 3, kind: input, shape index: {}]   ;;  %s542_s4 = inlined_call_operand.vmem [shape: f32[1,128], index: 4, kind: input, shape index: {}]   ;;  %s543_s5 = inlined_call_operand.vmem [shape: f32[2], index: 5, kind: input, shape index: {}]   ;;  %s544_s6 = inlined_call_operand.vmem [shape: f32[16,128], index: 6, kind: output, shape index: {}]  }
   0x1   :  { %12 = vsyncpa [#allocation4], 0  ;;  %s443_s21 = smov [#allocation2]   ;;  %s39_s25 = sshll.u32 %s543_s5, 4  ;;  %s40_s25 = int_to_ptr.vmem [resolvable:$true] %s39_s25 }
   0x2   :  { %s24_s22 = sshll.u32 %s443_s21, 4  ;;  %s405_s28 = scalar_lea.hbm %s541_s3, 1024  ;;  %s25_s22 = int_to_ptr.vmem [resolvable:$true] %s24_s22 }
   0x3   :  { %p406_p0 = scmp.ne.s32.totalorder %s541_s3, %s405_s28  ;;  %p409_p1 = scmp.lt.u32.totalorder %s405_s28, %s541_s3 }
   0x5   :  { %p411_p2 = pnand %p409_p1, %p406_p0 }
   0x7   :  { %414 = shalt.err (!%p411_p2)
}
   0x8   :  { %s415_s9 = scalar_lea.vmem %s25_s22, 1024  ;;  %p420_p4 = scmp.lt.s32.totalorder %s25_s22, %s25_s22 }
   0x9   :  { %p416_p3 = scmp.ne.s32.totalorder %s25_s22, %s415_s9  ;;  %p421_p5 = scmp.lt.s32.totalorder %s415_s9, %s415_s9 }
   0xb   :  { %p422_p6 = por %p421_p5, %p420_p4 }
   0xd   :  { %p423_p7 = pnand %p422_p6, %p416_p3 }
   0xf   :  { %426 = shalt.err (!%p423_p7)
}
  0x10   :  { %s444_s5 = smov 64   ;;  %s445_s10 = smov 4  }
  0x11   :  { %30 = dma.hbm_to_vmem [thread:$0]  %s541_s3, 1024, %s25_s22, [#allocation3], %s444_s5, %s444_s5, %s445_s10  }
  0x12   :  { %s427_s13 = scalar_lea.vmem %s40_s25, 16  ;;  %p432_p9 = scmp.lt.s32.totalorder %s40_s25, %s40_s25 }
  0x13   :  { %p428_p8 = scmp.ne.s32.totalorder %s40_s25, %s427_s13  ;;  %p433_p10 = scmp.lt.s32.totalorder %s427_s13, %s427_s13 }
  0x15   :  { %p434_p11 = por %p433_p10, %p432_p9 }
  0x17   :  { %p435_p12 = pnand %p434_p11, %p428_p8 }
  0x19   :  { %438 = shalt.err (!%p435_p12)
}
  0x1a   :  { %s446_s14 = smov [#allocation5]  }
  0x1b   :  { %42 = dma.vmem_to_smem %s40_s25, 16, %s446_s14, [#allocation4]  }
  0x1c   :  { %439 = dma.done.wait [#allocation3], 1024  }
  0x1d   :  { %440 = vsyncadd [#allocation3], 4294966272 }
  0x1e   :  { %441 = dma.done.wait [#allocation4], 16  }
  0x1f   :  { %442 = vsyncadd [#allocation4], 4294967280 }
  0x20   :  { %49 = sfence }
  0x21   :  { %v384_v0 = vld [vmem:[%s539_s1] sm:$0xff]   ;;  %v447_v1 = vmov 0.0   ;;  %v385_v2 = vld [vmem:[%s539_s1 + $0x8] sm:$0xff]   ;;  %vm448_vm0 = vmmov 0   ;;  %v386_v3 = vld [vmem:[%s539_s1 + $0x10] sm:$0xff]   ;;  %s300_s8 = sld [smem:[#allocation5 + $0x1]] }
  0x22   :  { %338 = vmatprep.subr.bf16.mxu0 %v447_v1  ;;  %358 = vmatprep.subr.bf16.mxu1 %v447_v1  ;;  %v393_v4 = vld [vmem:[#allocation2] sm:$0xff]   ;;  %v387_v5 = vld [vmem:[%s539_s1 + $0x18] sm:$0xff]   ;;  %v394_v6 = vld [vmem:[#allocation2 + $0x8] sm:$0xff]  }
  0x23   :  { %339 = vmatpush3.bf16.msra.mxu0 %v384_v0  ;;  %354 = vmatprep.mubr.msk.bf16.mxu0 %vm448_vm0, %v447_v1  ;;  %v388_v7 = vld [vmem:[%s539_s1 + $0x20] sm:$0xff]   ;;  %v395_v8 = vld [vmem:[#allocation2 + $0x10] sm:$0xff]   ;;  %v389_v9 = vld [vmem:[%s539_s1 + $0x28] sm:$0xff]  }
  0x24   :  { %340 = vmatprep.subr.bf16.mxu0 %v447_v1  ;;  %374 = vmatprep.mubr.msk.bf16.mxu1 %vm448_vm0, %v447_v1  ;;  %v390_v10 = vld [vmem:[%s539_s1 + $0x30] sm:$0xff]   ;;  %v391_v11 = vld [vmem:[%s539_s1 + $0x38] sm:$0xff]   ;;  %v392_v12 = vld [vmem:[%s538_s0] sm:$0xff]   ;;  %s51_s1 = sld [smem:[#allocation5]] }
  0x25   :  { %359 = vmatpush3.bf16.msra.mxu1 %v393_v4  ;;  %v396_v13 = vld [vmem:[#allocation2 + $0x18] sm:$0xff]   ;;  %v397_v14 = vld [vmem:[#allocation2 + $0x20] sm:$0xff]   ;;  %v398_v15 = vld [vmem:[#allocation2 + $0x28] sm:$0xff]  }
  0x26   :  { %360 = vmatprep.subr.bf16.mxu1 %v447_v1  ;;  %v399_v16 = vld [vmem:[#allocation2 + $0x30] sm:$0xff]   ;;  %v400_v17 = vld [vmem:[#allocation2 + $0x38] sm:$0xff]   ;;  %v301_v18 = vld [vmem:[%s540_s2] ss:$0 sm:$0xff] }
  0x27   :  { %341 = vmatpush3.bf16.msra.mxu0 %v385_v2  ;;  %v311_v31 = vld [vmem:[%s542_s4] ss:$0 sm:$0xff] }
  0x28   :  { %342 = vmatprep.subr.bf16.mxu0 %v447_v1 }
  0x29   :  { %361 = vmatpush3.bf16.msra.mxu1 %v394_v6 }
  0x2a   :  { %362 = vmatprep.subr.bf16.mxu1 %v447_v1  ;;  %s173_s9 = smul.f32 %s300_s8, %s51_s1 }
  0x2b   :  { %343 = vmatpush3.bf16.msra.mxu0 %v386_v3 }
  0x2c   :  { %344 = vmatprep.subr.bf16.mxu0 %v447_v1  ;;  %v174_v20 = vstv %s173_s9 }
  0x2d   :  { %363 = vmatpush3.bf16.msra.mxu1 %v395_v8 }
  0x2e   :  { %364 = vmatprep.subr.bf16.mxu1 %v447_v1 }
  0x2f   :  { %345 = vmatpush3.bf16.msra.mxu0 %v387_v5 }
  0x30   :  { %346 = vmatprep.subr.bf16.mxu0 %v447_v1 }
  0x31   :  { %365 = vmatpush3.bf16.msra.mxu1 %v396_v13 }
  0x32   :  { %366 = vmatprep.subr.bf16.mxu1 %v447_v1 }
  0x33   :  { %347 = vmatpush3.bf16.msra.mxu0 %v388_v7 }
  0x34   :  { %348 = vmatprep.subr.bf16.mxu0 %v447_v1 }
  0x35   :  { %367 = vmatpush3.bf16.msra.mxu1 %v397_v14 }
  0x36   :  { %368 = vmatprep.subr.bf16.mxu1 %v447_v1 }
  0x37   :  { %349 = vmatpush3.bf16.msra.mxu0 %v389_v9 }
  0x38   :  { %350 = vmatprep.subr.bf16.mxu0 %v447_v1 }
  0x39   :  { %369 = vmatpush3.bf16.msra.mxu1 %v398_v15 }
  0x3a   :  { %370 = vmatprep.subr.bf16.mxu1 %v447_v1 }
  0x3b   :  { %351 = vmatpush3.bf16.msra.mxu0 %v390_v10 }
  0x3c   :  { %352 = vmatprep.subr.bf16.mxu0 %v447_v1 }
  0x3d   :  { %371 = vmatpush3.bf16.msra.mxu1 %v399_v16 }
  0x3e   :  { %372 = vmatprep.subr.bf16.mxu1 %v447_v1 }
  0x3f   :  { %353 = vmatpush3.bf16.msra.mxu0 %v391_v11 }
  0x41   :  { %373 = vmatpush3.bf16.msra.mxu1 %v400_v17 }
  0x42   :  { %355 = vmatmul.mubr.bf16.vlgmr.msra.gmra.mrb[0].mxu0 %v392_v12 }
 0x115   :  { %v166_v19 = vpop.f32.mrb[0].mxu0 }
 0x116   :  { %v167_v21 = vadd.f32 %v301_v18, %v166_v19  ;;  %v356_v22 = vpop.f32.mrb[1].mxu0 }
 0x117   :  { %v169_v23 = vpop.f32.mrb[2].mxu0 }
 0x118   :  { %v175_v24 = vmul.f32 %v174_v20, %v167_v21  ;;  %v170_v25 = vadd.f32 %v301_v18, %v169_v23  ;;  %v357_v26 = vpop.f32.mrb[3].mxu0 }
 0x11a   :  { %v176_v27 = vmul.f32 %v174_v20, %v170_v25  ;;  %401 = vtanh.f32 %v175_v24 }
 0x11c   :  { %403 = vtanh.f32 %v176_v27 }
 0x124   :  { %v402_v28 = vpop.eup %401 }
 0x126   :  { %v404_v29 = vpop.eup %403 }
 0x127   :  { %v179_v30 = vpack.c.bf16 %v404_v29, %v402_v28 }
 0x129   :  { %375 = vmatmul.mubr.bf16.vlgmr.msra.gmra.mrb[0].mxu1 %v179_v30 }
 0x1fc   :  { %v285_v32 = vpop.f32.mrb[0].mxu1 }
 0x1fd   :  { %v286_v33 = vadd.f32 %v311_v31, %v285_v32  ;;  %v376_v34 = vpop.f32.mrb[1].mxu1 }
 0x1fe   :  { %v288_v35 = vpop.f32.mrb[2].mxu1 }
 0x1ff   :  { %292 = vst [vmem:[%s544_s6] sm:$0xff] %v286_v33  ;;  %v289_v36 = vadd.f32 %v311_v31, %v288_v35  ;;  %v377_v37 = vpop.f32.mrb[3].mxu1 }
 0x201   :  { %293 = vst [vmem:[%s544_s6 + $0x8] sm:$0xff] %v289_v36 }
 0x202   :  { %298 = vsyncpa [#allocation3], 1 }
 0x203   :  { %299 = vsyncpa [#allocation4], 1 }

</bundles_post_ra>
